<compile_context>
chip_gen: v7x
topology: tpu7x:2x2x1
jax: 0.10.0
libtpu: 0.0.40
codegen_flags: <defaults>
</compile_context>

<pallas_src>
import jax
import jax.numpy as jnp
from jax.experimental import pallas as pl
from jax.experimental.pallas import tpu as pltpu

_LANE = 128
_NT_DIMS = (((1,), (1,)), ((), ()))   # contract the last dim of both operands


def _round_up(x, n):
    return ((x + n - 1) // n) * n


def _mlp_kernel(x_ref, w1_ref, b1_ref, w2_ref, b2_ref, w3_ref, b3_ref, o_ref):
    # x: (TM, D); w1: (D, H1); w2: (H1, H2); w3: (1, H2); b3: (1, 1); o: (1, TM)
    h = jnp.dot(x_ref[...], w1_ref[...], preferred_element_type=jnp.float32)
    h = jnp.maximum(h + b1_ref[...], 0.0)          # Dropout (inference) + ReLU
    h = h.astype(w2_ref.dtype)
    h = jnp.dot(h, w2_ref[...], preferred_element_type=jnp.float32)
    h = jnp.maximum(h + b2_ref[...], 0.0)          # Dropout (inference) + ReLU
    h = h.astype(w3_ref.dtype)
    # Final 1-wide layer as NT contraction (1,H2).(TM,H2)^T -> (1,TM): keeps the
    # output lane-dense — no 128-lane zero padding, no padded output slab.
    out = jax.lax.dot_general(w3_ref[...], h, _NT_DIMS,
                              preferred_element_type=jnp.float32)
    o_ref[...] = (out + b3_ref[...]).astype(o_ref.dtype)


def prepare_params(params):
    """One-time weight preprocessing (hoisted out of the per-call path)."""
    w1, b1 = params["w1"], params["b1"]
    w2, b2 = params["w2"], params["b2"]
    w3, b3 = params["w3"], params["b3"]
    return dict(
        w1t=jnp.asarray(w1).T,                # (D,  H1)
        b1r=jnp.asarray(b1).reshape(1, -1),   # (1,  H1)
        w2t=jnp.asarray(w2).T,                # (H1, H2)
        b2r=jnp.asarray(b2).reshape(1, -1),   # (1,  H2)
        w3r=jnp.asarray(w3).reshape(1, -1),   # (1,  H2)
        b3r=jnp.asarray(b3).reshape(1, 1),    # (1,  1)
    )


def _pick_row_tile(m, tile_m):
    """Row tile: == m (single block) or a multiple of 128, so both the (tm, d)
    x block (sublane dim) and the (1, tm) output block (lane dim) satisfy the
    (8, 128) divisibility rule; aims for >= 2 grid steps (v7x megacore)."""
    if m <= _LANE:
        return m
    max_tile = max(_LANE, (tile_m // _LANE) * _LANE)
    half = _round_up(pl.cdiv(m, 2), _LANE)    # always < m when m > 128
    return min(max_tile, half)


def fusion_discriminator_prepared(x, prepped, *, tile_m=1024, use_bf16=False):
    w1t, b1r = prepped["w1t"], prepped["b1r"]
    w2t, b2r = prepped["w2t"], prepped["b2r"]
    w3r, b3r = prepped["w3r"], prepped["b3r"]

    d = x.shape[-1]
    h1 = w1t.shape[1]
    h2 = w2t.shape[1]
    lead = x.shape[:-1]
    m = 1
    for s in lead:
        m *= int(s)

    x2 = x.reshape(m, d)
    if use_bf16:
        # Optional bandwidth lever (numerics-visible): bf16 operands, f32 accum.
        x2 = x2.astype(jnp.bfloat16)
        w1t = w1t.astype(jnp.bfloat16)
        w2t = w2t.astype(jnp.bfloat16)
        w3r = w3r.astype(jnp.bfloat16)

    tm = _pick_row_tile(m, tile_m)
    grid = (pl.cdiv(m, tm),)          # ragged tail masked by Pallas, no jnp.pad

    in_bytes = x2.dtype.itemsize
    vmem_needed = (
        2 * tm * d * in_bytes                        # x tiles (double buffered)
        + 2 * tm * 4                                 # (1, tm) out tiles (dbl buf)
        + 2 * (d * h1 + h1 * h2 + h2) * in_bytes     # resident weights (dbl buf)
        + 2 * (h1 + h2 + 1) * 4                      # biases
        + tm * (h1 + h2 + 1) * 4                     # f32 intermediates
    )
    try:
        vmem_cap = pltpu.get_tpu_info().vmem_capacity_bytes
    except Exception:                                # pragma: no cover
        vmem_cap = 64 * 1024 * 1024                  # v7x-safe fallback
    vmem_limit = int(min(max(4 * vmem_needed, 32 * 1024 * 1024),
                         (3 * vmem_cap) // 4))       # <=48 MiB v7x, <=96 MiB v6e

    flops = 2 * m * (d * h1 + h1 * h2 + h2 * 1)
    bytes_accessed = (m * d * in_bytes + m * 4
                      + (d * h1 + h1 * h2 + h2) * in_bytes
                      + (h1 + h2 + 1) * 4)

    out = pl.pallas_call(
        _mlp_kernel,
        out_shape=jax.ShapeDtypeStruct((1, m), jnp.float32),
        grid_spec=pltpu.PrefetchScalarGridSpec(
            num_scalar_prefetch=0,
            grid=grid,
            in_specs=[
                pl.BlockSpec((tm, d), lambda i: (i, 0)),    # x rows (streamed)
                pl.BlockSpec((d, h1), lambda i: (0, 0)),    # W1^T (resident)
                pl.BlockSpec((1, h1), lambda i: (0, 0)),    # b1
                pl.BlockSpec((h1, h2), lambda i: (0, 0)),   # W2^T (resident)
                pl.BlockSpec((1, h2), lambda i: (0, 0)),    # b2
                pl.BlockSpec((1, h2), lambda i: (0, 0)),    # w3 row (resident)
                pl.BlockSpec((1, 1), lambda i: (0, 0)),     # b3
            ],
            out_specs=pl.BlockSpec((1, tm), lambda i: (0, i)),  # lane-dense out
        ),
        compiler_params=pltpu.CompilerParams(
            dimension_semantics=("parallel",),
            vmem_limit_bytes=vmem_limit,
        ),
        cost_estimate=pl.CostEstimate(
            flops=flops, transcendentals=0, bytes_accessed=bytes_accessed),
    )(x2, w1t, b1r, w2t, b2r, w3r, b3r)

    # (1, m) -> (*lead, 1) is data-order preserving (pure reshape, no slice).
    return out.reshape(*lead, 1)


def fusion_discriminator(x, params, **kwargs):
    return fusion_discriminator_prepared(x, prepare_params(params), **kwargs)


if __name__ == "__main__":
    key = jax.random.PRNGKey(0)
    batch, seq, in_dim = 2, 8, 32
    h1, h2 = in_dim // 2, in_dim // 4

    keys = jax.random.split(key, 8)
    x = jax.random.normal(keys[0], (batch, seq, in_dim), dtype=jnp.float32)

    def linear_init(kw, kb, fan_out, fan_in):
        bound = 1.0 / (fan_in ** 0.5)
        w = jax.random.uniform(kw, (fan_out, fan_in), jnp.float32, -bound, bound)
        b = jax.random.uniform(kb, (fan_out,), jnp.float32, -bound, bound)
        return w, b

    w1, b1 = linear_init(keys[1], keys[2], h1, in_dim)
    w2, b2 = linear_init(keys[3], keys[4], h2, h1)
    w3, b3 = linear_init(keys[5], keys[6], 1, h2)
    params = dict(w1=w1, b1=b1, w2=w2, b2=b2, w3=w3, b3=b3)

    def ref_fwd(xs):
        a1 = jnp.maximum(xs @ w1.T + b1, 0.0)   # Dropout = identity at eval
        a2 = jnp.maximum(a1 @ w2.T + b2, 0.0)
        return a2 @ w3.T + b3

    prepped = prepare_params(params)            # hoisted: done once, not per call
    fwd = jax.jit(lambda xs: fusion_discriminator_prepared(xs, prepped))

    # Case 1: small single-block grid.
    y = fwd(x)
    jax.block_until_ready(y)
    assert y.shape == (batch, seq, 1), y.shape
    y_ref = ref_fwd(x)
    err = float(jnp.max(jnp.abs(y - y_ref)))
    assert jnp.allclose(y, y_ref, atol=5e-5, rtol=5e-5), err

    # Case 2: multi-step grid (>=2 "parallel" steps for megacore) + ragged tail.
    x_big = jax.random.normal(keys[7], (4, 75, in_dim), dtype=jnp.float32)
    y_big = fwd(x_big)
    jax.block_until_ready(y_big)
    assert y_big.shape == (4, 75, 1), y_big.shape
    y_big_ref = ref_fwd(x_big)
    err_big = float(jnp.max(jnp.abs(y_big - y_big_ref)))
    assert jnp.allclose(y_big, y_big_ref, atol=5e-5, rtol=5e-5), err_big

    print("KERNEL_OK")
</pallas_src>

<mosaic_0001>
module attributes {stable_mosaic.version = 11 : i64} {
  func.func @_mlp_kernel(%arg0: i32, %arg1: memref<16x32xf32, #tpu.memory_space<vmem>>, %arg2: memref<32x16xf32, #tpu.memory_space<vmem>>, %arg3: memref<1x16xf32, #tpu.memory_space<vmem>>, %arg4: memref<16x8xf32, #tpu.memory_space<vmem>>, %arg5: memref<1x8xf32, #tpu.memory_space<vmem>>, %arg6: memref<1x8xf32, #tpu.memory_space<vmem>>, %arg7: memref<1x1xf32, #tpu.memory_space<vmem>>, %arg8: memref<1x16xf32, #tpu.memory_space<vmem>>) attributes {dimension_semantics = [#tpu.dimension_semantics<parallel>], iteration_bounds = array<i64: 1>, scalar_prefetch = 0 : i64, scratch_operands = 0 : i64, tpu.core_type = #tpu.core_type<tc>, window_params = [{transform_indices = @transform_0, window_bounds = array<i64: 16, 32>}, {pipeline_mode = #tpu.pipeline_mode<synchronous>, transform_indices = @transform_1, window_bounds = array<i64: 32, 16>}, {pipeline_mode = #tpu.pipeline_mode<synchronous>, transform_indices = @transform_2, window_bounds = array<i64: 1, 16>}, {pipeline_mode = #tpu.pipeline_mode<synchronous>, transform_indices = @transform_3, window_bounds = array<i64: 16, 8>}, {pipeline_mode = #tpu.pipeline_mode<synchronous>, transform_indices = @transform_4, window_bounds = array<i64: 1, 8>}, {pipeline_mode = #tpu.pipeline_mode<synchronous>, transform_indices = @transform_5, window_bounds = array<i64: 1, 8>}, {pipeline_mode = #tpu.pipeline_mode<synchronous>, transform_indices = @transform_6, window_bounds = array<i64: 1, 1>}, {transform_indices = @transform_7, window_bounds = array<i64: 1, 16>}]} {
    %c0 = arith.constant 0 : index
    %c0_0 = arith.constant 0 : index
    %0 = vector.load %arg1[%c0, %c0_0] : memref<16x32xf32, #tpu.memory_space<vmem>>, vector<16x32xf32>
    %c0_1 = arith.constant 0 : index
    %c0_2 = arith.constant 0 : index
    %1 = vector.load %arg2[%c0_1, %c0_2] : memref<32x16xf32, #tpu.memory_space<vmem>>, vector<32x16xf32>
    %cst = arith.constant dense<0.000000e+00> : vector<16x16xf32>
    %2 = tpu.matmul %0, %1, %cst {dimension_numbers = #tpu.dot_dimension_numbers<[1], [0], [0], [1], [0, 0, 1, 1], [], []>} : vector<16x32xf32>, vector<32x16xf32>, vector<16x16xf32> -> vector<16x16xf32>
    %c0_3 = arith.constant 0 : index
    %c0_4 = arith.constant 0 : index
    %3 = vector.load %arg3[%c0_3, %c0_4] : memref<1x16xf32, #tpu.memory_space<vmem>>, vector<1x16xf32>
    %4 = vector.broadcast %3 : vector<1x16xf32> to vector<16x16xf32>
    %5 = arith.addf %2, %4 : vector<16x16xf32>
    %cst_5 = arith.constant 0.000000e+00 : f32
    %6 = vector.broadcast %cst_5 : f32 to vector<16x16xf32>
    %7 = arith.maximumf %5, %6 : vector<16x16xf32>
    %c0_6 = arith.constant 0 : index
    %c0_7 = arith.constant 0 : index
    %8 = vector.load %arg4[%c0_6, %c0_7] : memref<16x8xf32, #tpu.memory_space<vmem>>, vector<16x8xf32>
    %cst_8 = arith.constant dense<0.000000e+00> : vector<16x8xf32>
    %9 = tpu.matmul %7, %8, %cst_8 {dimension_numbers = #tpu.dot_dimension_numbers<[1], [0], [0], [1], [0, 0, 1, 1], [], []>} : vector<16x16xf32>, vector<16x8xf32>, vector<16x8xf32> -> vector<16x8xf32>
    %c0_9 = arith.constant 0 : index
    %c0_10 = arith.constant 0 : index
    %10 = vector.load %arg5[%c0_9, %c0_10] : memref<1x8xf32, #tpu.memory_space<vmem>>, vector<1x8xf32>
    %11 = vector.broadcast %10 : vector<1x8xf32> to vector<16x8xf32>
    %12 = arith.addf %9, %11 : vector<16x8xf32>
    %cst_11 = arith.constant 0.000000e+00 : f32
    %13 = vector.broadcast %cst_11 : f32 to vector<16x8xf32>
    %14 = arith.maximumf %12, %13 : vector<16x8xf32>
    %c0_12 = arith.constant 0 : index
    %c0_13 = arith.constant 0 : index
    %15 = vector.load %arg6[%c0_12, %c0_13] : memref<1x8xf32, #tpu.memory_space<vmem>>, vector<1x8xf32>
    %cst_14 = arith.constant dense<0.000000e+00> : vector<1x16xf32>
    %16 = tpu.matmul %15, %14, %cst_14 {dimension_numbers = #tpu.dot_dimension_numbers<[1], [1], [0], [0], [0, 0, 1, 0], [], []>} : vector<1x8xf32>, vector<16x8xf32>, vector<1x16xf32> -> vector<1x16xf32>
    %c0_15 = arith.constant 0 : index
    %c0_16 = arith.constant 0 : index
    %17 = vector.load %arg7[%c0_15, %c0_16] : memref<1x1xf32, #tpu.memory_space<vmem>>, vector<1x1xf32>
    %18 = vector.broadcast %17 : vector<1x1xf32> to vector<1x16xf32>
    %19 = arith.addf %16, %18 : vector<1x16xf32>
    %c0_17 = arith.constant 0 : index
    %c0_18 = arith.constant 0 : index
    %20 = vector.load %arg8[%c0_17, %c0_18] : memref<1x16xf32, #tpu.memory_space<vmem>>, vector<1x16xf32>
    tpu.vector_store %arg8[%c0_17, %c0_18], %19 {strides = array<i32>} : memref<1x16xf32, #tpu.memory_space<vmem>>, vector<1x16xf32>,
    return
  }
  func.func @transform_0(%arg0: i32) -> (i32, i32) {
    %c0_i32 = arith.constant 0 : i32
    %c0_i32_0 = arith.constant 0 : i32
    return %arg0, %c0_i32 : i32, i32
  }
  func.func @transform_1(%arg0: i32) -> (i32, i32) {
    %c0_i32 = arith.constant 0 : i32
    %c0_i32_0 = arith.constant 0 : i32
    %c0_i32_1 = arith.constant 0 : i32
    return %c0_i32, %c0_i32_0 : i32, i32
  }
  func.func @transform_2(%arg0: i32) -> (i32, i32) {
    %c0_i32 = arith.constant 0 : i32
    %c0_i32_0 = arith.constant 0 : i32
    %c0_i32_1 = arith.constant 0 : i32
    return %c0_i32, %c0_i32_0 : i32, i32
  }
  func.func @transform_3(%arg0: i32) -> (i32, i32) {
    %c0_i32 = arith.constant 0 : i32
    %c0_i32_0 = arith.constant 0 : i32
    %c0_i32_1 = arith.constant 0 : i32
    return %c0_i32, %c0_i32_0 : i32, i32
  }
  func.func @transform_4(%arg0: i32) -> (i32, i32) {
    %c0_i32 = arith.constant 0 : i32
    %c0_i32_0 = arith.constant 0 : i32
    %c0_i32_1 = arith.constant 0 : i32
    return %c0_i32, %c0_i32_0 : i32, i32
  }
  func.func @transform_5(%arg0: i32) -> (i32, i32) {
    %c0_i32 = arith.constant 0 : i32
    %c0_i32_0 = arith.constant 0 : i32
    %c0_i32_1 = arith.constant 0 : i32
    return %c0_i32, %c0_i32_0 : i32, i32
  }
  func.func @transform_6(%arg0: i32) -> (i32, i32) {
    %c0_i32 = arith.constant 0 : i32
    %c0_i32_0 = arith.constant 0 : i32
    %c0_i32_1 = arith.constant 0 : i32
    return %c0_i32, %c0_i32_0 : i32, i32
  }
  func.func @transform_7(%arg0: i32) -> (i32, i32) {
    %c0_i32 = arith.constant 0 : i32
    %c0_i32_0 = arith.constant 0 : i32
    return %c0_i32, %arg0 : i32, i32
  }
}

</mosaic_0001>

<bundles_post_ra>
// kernel: _lambda_.1
= control target key start
LH: loop header
LB: loop body
LE: loop exit
PB: predicated region body
PF: predicated region fallthrough
CT: control target
= control target key end

     0   :  { %s609_s0 = inlined_call_operand.hbm [shape: f32[16,32], index: 0, kind: input, shape index: {}]   ;;  %s610_s1 = inlined_call_operand.hbm [shape: f32[32,16], index: 1, kind: input, shape index: {}]   ;;  %s611_s2 = inlined_call_operand.hbm [shape: f32[1,16], index: 2, kind: input, shape index: {}]   ;;  %s612_s3 = inlined_call_operand.vmem [shape: f32[16,8], index: 3, kind: input, shape index: {}]   ;;  %s613_s4 = inlined_call_operand.vmem [shape: f32[1,8], index: 4, kind: input, shape index: {}]   ;;  %s614_s5 = inlined_call_operand.vmem [shape: f32[1,8], index: 5, kind: input, shape index: {}]   ;;  %s615_s6 = inlined_call_operand.<no memory space> [shape: f32[1,1], index: 6, kind: input, shape index: {}]   ;;  %s616_s7 = inlined_call_operand.vmem [shape: f32[1,16], index: 7, kind: output, shape index: {}]  }
   0x1   :  { %v12_v0 = vstv %s615_s6 }
   0x2   :  { %13 = vst [vmem:[#allocation2] sm:$0x1] %v12_v0 }
   0x3   :  { %14 = vsyncpa [#allocation4], 0 }
   0x4   :  { %15 = vsyncpa [#allocation6], 0  ;;  %s499_s26 = smov [#allocation5]   ;;  %s500_s28 = smov [#allocation3]  }
   0x5   :  { %s33_s27 = sshll.u32 %s499_s26, 4  ;;  %s21_s29 = sshll.u32 %s500_s28, 4  ;;  %s34_s27 = int_to_ptr.vmem [resolvable:$true] %s33_s27  ;;  %s551_s29 = int_to_ptr.vmem [resolvable:$true] %s21_s29 }
   0x6   :  { %s429_s9 = scalar_lea.hbm %s610_s1, 512 }
   0x7   :  { %p430_p0 = scmp.ne.s32.totalorder %s610_s1, %s429_s9  ;;  %p433_p1 = scmp.lt.u32.totalorder %s429_s9, %s610_s1 }
   0x9   :  { %p435_p2 = pnand %p433_p1, %p430_p0 }
   0xb   :  { %438 = shalt.err (!%p435_p2)
}
   0xc   :  { %s439_s13 = scalar_lea.vmem %s34_s27, 512  ;;  %p444_p4 = scmp.lt.s32.totalorder %s34_s27, %s34_s27 }
   0xd   :  { %p440_p3 = scmp.ne.s32.totalorder %s34_s27, %s439_s13  ;;  %p445_p5 = scmp.lt.s32.totalorder %s439_s13, %s439_s13 }
   0xf   :  { %p446_p6 = por %p445_p5, %p444_p4 }
  0x11   :  { %p447_p7 = pnand %p446_p6, %p440_p3 }
  0x13   :  { %450 = shalt.err (!%p447_p7)
}
  0x14   :  { %s501_s14 = smov 128   ;;  %s502_s15 = smov 8  }
  0x15   :  { %39 = dma.hbm_to_vmem [thread:$0]  %s610_s1, 512, %s34_s27, [#allocation6], %s501_s14, %s501_s14, %s502_s15  }
  0x16   :  { %s451_s20 = scalar_lea.hbm %s609_s0, 256 }
  0x17   :  { %p452_p8 = scmp.ne.s32.totalorder %s609_s0, %s451_s20  ;;  %p455_p9 = scmp.lt.u32.totalorder %s451_s20, %s609_s0 }
  0x19   :  { %p457_p10 = pnand %p455_p9, %p452_p8 }
  0x1b   :  { %460 = shalt.err (!%p457_p10)
}
  0x1c   :  { %s461_s25 = scalar_lea.vmem %s551_s29, 256  ;;  %p466_p12 = scmp.lt.s32.totalorder %s551_s29, %s551_s29 }
  0x1d   :  { %p462_p11 = scmp.ne.s32.totalorder %s551_s29, %s461_s25  ;;  %p467_p13 = scmp.lt.s32.totalorder %s461_s25, %s461_s25 }
  0x1f   :  { %p468_p0 = por %p467_p13, %p466_p12 }
  0x21   :  { %p469_p1 = pnand %p468_p0, %p462_p11 }
  0x23   :  { %472 = shalt.err (!%p469_p1)
}
  0x24   :  { %27 = dma.hbm_to_vmem [thread:$0]  %s609_s0, 256, %s551_s29, [#allocation4], %s501_s14, %s501_s14, %s502_s15  }
  0x25   :  { %s503_s27 = smov [#allocation7]   ;;  %s473_s9 = scalar_lea.hbm %s611_s2, 16 }
  0x26   :  { %s46_s28 = sshll.u32 %s503_s27, 4  ;;  %p474_p2 = scmp.ne.s32.totalorder %s611_s2, %s473_s9  ;;  %s47_s28 = int_to_ptr.vmem [resolvable:$true] %s46_s28 }
  0x27   :  { %p477_p3 = scmp.lt.u32.totalorder %s473_s9, %s611_s2 }
  0x29   :  { %p479_p4 = pnand %p477_p3, %p474_p2 }
  0x2b   :  { %482 = shalt.err (!%p479_p4)
}
  0x2c   :  { %s483_s13 = scalar_lea.vmem %s47_s28, 16  ;;  %s487_s0 = scalar_lea.vmem %s47_s28, 32 }
  0x2d   :  { %p484_p5 = scmp.ne.s32.totalorder %s47_s28, %s483_s13  ;;  %p488_p6 = scmp.lt.s32.totalorder %s47_s28, %s47_s28 }
  0x2e   :  { %p489_p7 = scmp.lt.s32.totalorder %s487_s0, %s483_s13 }
  0x30   :  { %p490_p8 = por %p489_p7, %p488_p6 }
  0x32   :  { %p491_p9 = pnand %p490_p8, %p484_p5 }
  0x34   :  { %494 = shalt.err (!%p491_p9)
}
  0x35   :  { %49 = dma.hbm_to_vmem [thread:$0]  %s611_s2, 16, %s47_s28, [#allocation6]  }
  0x36   :  { %495 = dma.done.wait [#allocation4], 256  }
  0x37   :  { %496 = vsyncadd [#allocation4], 4294967040 }
  0x38   :  { %497 = dma.done.wait [#allocation6], 528  }
  0x39   :  { %498 = vsyncadd [#allocation6], 4294966768  ;;  %vm80_vm0 = vcmask 261120   ;;  %v69_v1 = vld [vmem:[#allocation5] sm:$0xff]  ;;  %v70_v2 = vld [vmem:[#allocation5 + $0x8] sm:$0xff]  ;;  %vm173_vm1 = vcmask 130048   ;;  %v264_v32 = vlaneseq }
  0x3a   :  { %v71_v3 = vld [vmem:[#allocation5 + $0x10] sm:$0xff]  ;;  %v403_v4 = vpack.c.bf16 %v70_v2, %v69_v1  ;;  %v72_v5 = vld [vmem:[#allocation5 + $0x18] sm:$0xff]  ;;  %v356_v12 = vld [vmem:[#allocation7] ss:$0 sm:$0xff]  ;;  %v504_v19 = vmov 0.0|0.0   ;;  %vm505_vm2 = vmmov 0  }
  0x3b   :  { %v67_v6 = vld [vmem:[#allocation3] sm:$0xff]  ;;  %v407_v7 = vpack.c.bf16 %v72_v5, %v71_v3  ;;  %v68_v8 = vld [vmem:[#allocation3 + $0x8] sm:$0xff]  ;;  %v506_v20 = vmov 0.0   ;;  %v258_v21 = vld [vmem:[#allocation2] sm:$0x1]  ;;  %v507_v22 = vmov 0  }
  0x3c   :  { %386 = vmatprep.mubr.msk.f32.mxu0 %vm80_vm0, %v67_v6  ;;  %404 = vmatprep.subr.bf16.mxu0 %v403_v4  ;;  %v164_v9 = vld [vmem:[%s612_s3] sm:$0xff]  ;;  %v165_v10 = vld [vmem:[%s612_s3 + $0x8] sm:$0xff]  ;;  %vm268_vm3 = vcmask 64512   ;;  %v265_v33 = vshrl.u32 %v264_v32, 7  ;;  %vm348_vm5 = vcmask 122880  }
  0x3d   :  { %406 = vmatpush3.bf16.msra.mxu0 %v403_v4  ;;  %v411_v11 = vpack.c.bf16 %v165_v10, %v164_v9  ;;  %428 = vset.pattern.permute.xlu0 %v507_v22  ;;  %v359_v23 = vld [vmem:[%s613_s4] ss:$0 sm:$0xff]  ;;  %vm417_vm4 = vmpackc.low %vm268_vm3, %vm268_vm3 }
  0x3e   :  { %408 = vmatprep.subr.bf16.mxu0 %v407_v7  ;;  %261 = vperm.xlu0 %428, %v258_v21   ;;  %v257_v31 = vld [vmem:[%s614_s5] sm:$0x1]  ;;  %v266_v34 = vsub.s32 0, %v265_v33 }
  0x3f   :  { %412 = vmatprep.subr.bf16.mxu1 %v411_v11 }
  0x40   :  { %414 = vmatpush3.bf16.msra.mxu1 %v411_v11 }
  0x41   :  { %410 = vmatpush3.bf16.msra.mxu0 %v407_v7  ;;  %415 = vmatprep.subr.bf16.mxu1 %v504_v19 }
  0x44   :  { %387 = vmatmul.mubr.msk.f32.vlgmr.msra.gmra.mrb[0].mxu0 %vm80_vm0, %v68_v8 }
  0xbd   :  { %v262_v35 = vpop.permute.xlu0 %261 }
  0xbe   :  { %v267_v36 = vrot.slane %v262_v35, %v266_v34 }
 0x117   :  { %v388_v13 = vpop.f32.mrb[0].mxu0 }
 0x118   :  { %v159_v14 = vadd.f32 %v388_v13, %v356_v12  ;;  %v153_v15 = vpop.f32.mrb[1].mxu0 }
 0x119   :  { %v154_v16 = vadd.f32 %v356_v12, %v153_v15 }
 0x11a   :  { %v163_v18 = vmax.f32 %v159_v14, 0.0 }
 0x11b   :  { %v162_v17 = vmax.f32 %v154_v16, 0.0 }
 0x11d   :  { %393 = vmatprep.mubr.msk.f32.mxu1 %vm173_vm1, %v162_v17 }
 0x11e   :  { %394 = vmatmul.mubr.msk.f32.vlgmr.msra.gmra.mrb[0].mxu1 %vm173_vm1, %v163_v18 }
 0x11f   :  { %400 = vmatprep.mubr.msk.f32.mxu1 %vm505_vm2, %v506_v20 }
 0x1f1   :  { %v395_v24 = vpop.f32.mrb[0].mxu1 }
 0x1f2   :  { %v252_v25 = vadd.f32 %v395_v24, %v359_v23  ;;  %v246_v26 = vpop.f32.mrb[1].mxu1 }
 0x1f3   :  { %v247_v27 = vadd.f32 %v359_v23, %v246_v26 }
 0x1f4   :  { %v256_v28 = vmax.f32 %v252_v25, 0.0 }
 0x1f5   :  { %v255_v29 = vmax.f32 %v247_v27, 0.0 }
 0x1f7   :  { %v416_v30 = vpack.c.bf16 %v256_v28, %v255_v29 }
 0x1f9   :  { %418 = vmatpush3.bf16.xpose.msk.msra.mxu1 %vm417_vm4, %v416_v30 }
 0x200   :  { %401 = vmatmul.mubr.msk.f32.vlgmr.msra.gmra.mrb[2].mxu1 %vm268_vm3, %v257_v31 }
 0x2d3   :  { %v344_v37 = vpop.f32.mrb[2].mxu1 }
 0x2d4   :  { %v345_v38 = vadd.f32 %v344_v37, %v267_v36  ;;  %v402_v39 = vpop.f32.mrb[3].mxu1 }
 0x2d6   :  { %349 = vst.msk [vmem:[%s616_s7] sm:$0x1] %vm348_vm5, %v345_v38 }
 0x2d7   :  { %354 = vsyncpa [#allocation4], 1 }
 0x2d8   :  { %355 = vsyncpa [#allocation6], 1 }

</bundles_post_ra>
